<compile_context>
chip_gen: v6e
topology: v6e:2x2x1
jax: 0.10.0
libtpu: 0.0.40
codegen_flags: <defaults>
</compile_context>

<pallas_src>
import functools

import jax
import jax.numpy as jnp
from jax.experimental import pallas as pl
from jax.experimental.pallas import tpu as pltpu


def _cosine_loss_kernel(s_ref, t_ref, y_ref, out_ref, acc_ref, *,
                        margin, eps, n_rows, block_rows, steps_per_slice,
                        needs_mask):
    c = pl.program_id(0)          # slice (TensorCore) id  -- "parallel"
    i = pl.program_id(1)          # step within the slice  -- "arbitrary"

    @pl.when(i == 0)
    def _init():
        acc_ref[...] = jnp.zeros_like(acc_ref)

    # Promote to f32 inside the kernel only (inputs stream in native dtype).
    s = s_ref[...].astype(jnp.float32)                       # (TN, D)
    t = t_ref[...].astype(jnp.float32)                       # (TN, D)
    y = y_ref[...]                                           # (TN, 1) f32

    dot = jnp.sum(s * t, axis=-1, keepdims=True)             # (TN, 1)
    ss = jnp.sum(s * s, axis=-1, keepdims=True)
    tt = jnp.sum(t * t, axis=-1, keepdims=True)
    # PyTorch ATen: cos = dot / sqrt((ss + eps) * (tt + eps)); rsqrt -> EUP.
    cos = dot * jax.lax.rsqrt((ss + eps) * (tt + eps))       # (TN, 1)

    pos_loss = 1.0 - cos
    neg_loss = jnp.maximum(cos - margin, 0.0)
    per_row = jnp.where(y > 0.0, pos_loss, neg_loss)         # (TN, 1)

    if needs_mask:
        # Mask rows that are ragged-tail padding or come from a clamped
        # (duplicated) block index so they contribute exactly 0 to the sum.
        logical_block = c * steps_per_slice + i
        row0 = logical_block * block_rows
        row_ids = row0 + jax.lax.broadcasted_iota(jnp.int32, per_row.shape, 0)
        per_row = jnp.where(row_ids < n_rows, per_row, 0.0)

    acc_ref[...] += jnp.sum(per_row, axis=0, keepdims=True)  # (1, 1)

    @pl.when(i == steps_per_slice - 1)
    def _finalize():
        out_ref[...] = acc_ref[...]


def cosine_loss(student_rep, teacher_rep, target, *, gamma, margin=0.0,
                eps=1e-12, block_rows=1024, num_slices=2):
    """gamma * CosineEmbeddingLoss(student_rep, teacher_rep, target), mean reduction."""
    n, d = student_rep.shape
    assert teacher_rep.shape == (n, d)
    assert n >= 1

    # (N, 1) f32 target block is tiny; do NOT pre-cast s/t in the wrapper.
    target2d = jnp.asarray(target).reshape(n, 1).astype(jnp.float32)

    s_bytes = jnp.dtype(student_rep.dtype).itemsize
    t_bytes = jnp.dtype(teacher_rep.dtype).itemsize

    # ---- pick the row tile ---------------------------------------------------
    # Hard constraint: second-to-last block dim divisible by 8 (or == N).
    # Soft constraint: multiple of the sublane packing of the narrowest dtype.
    sub = 8
    for sz in (s_bytes, t_bytes):
        if sz == 2:
            sub = max(sub, 16)
        elif sz == 1:
            sub = max(sub, 32)
    bytes_per_row = d * (s_bytes + t_bytes) + target2d.dtype.itemsize
    budget = 24 * 1024 * 1024      # double-buffered input budget; safe on v5e/v6e/v7x
    max_rows = max(sub, (budget // (2 * bytes_per_row)) // sub * sub)
    tn = min(int(block_rows), int(max_rows))
    if tn >= n:
        tn = n                      # full-extent block: always legal
    else:
        tn = max(sub, (tn // sub) * sub)

    n_blocks = pl.cdiv(n, tn)
    num_slices = max(1, min(int(num_slices), n_blocks))
    steps_per_slice = pl.cdiv(n_blocks, num_slices)

    # Masking only needed for ragged tails or duplicated (clamped) blocks.
    needs_mask = (n % tn != 0) or (num_slices * steps_per_slice != n_blocks)

    def row_block(c, i):
        # Clamp to a valid block; out-of-range logical blocks are fully masked
        # inside the kernel, so the duplicated read is harmless.
        return jnp.minimum(c * steps_per_slice + i, n_blocks - 1)

    kernel = functools.partial(
        _cosine_loss_kernel,
        margin=float(margin), eps=float(eps), n_rows=int(n),
        block_rows=int(tn), steps_per_slice=int(steps_per_slice),
        needs_mask=bool(needs_mask),
    )

    vmem_limit = int(min(64 * 1024 * 1024,
                         max(16 * 1024 * 1024,
                             2 * tn * bytes_per_row + (8 << 20))))

    partials = pl.pallas_call(
        kernel,
        out_shape=jax.ShapeDtypeStruct((num_slices, 1), jnp.float32),
        grid=(num_slices, steps_per_slice),
        in_specs=[
            pl.BlockSpec((tn, d), lambda c, i: (row_block(c, i), 0)),  # student rows
            pl.BlockSpec((tn, d), lambda c, i: (row_block(c, i), 0)),  # teacher rows
            pl.BlockSpec((tn, 1), lambda c, i: (row_block(c, i), 0)),  # target (+1/-1)
        ],
        out_specs=pl.BlockSpec((1, 1), lambda c, i: (c, 0)),
        scratch_shapes=[pltpu.VMEM((1, 1), jnp.float32)],
        compiler_params=pltpu.CompilerParams(
            dimension_semantics=("parallel", "arbitrary"),
            vmem_limit_bytes=vmem_limit,
        ),
    )(student_rep, teacher_rep, target2d)

    # Tiny epilogue in the wrapper: sum per-slice partials, mean, gamma.
    return (jnp.float32(gamma) / jnp.float32(n)) * jnp.sum(partials)


def _reference(student_rep, teacher_rep, target, gamma, margin=0.0, eps=1e-12):
    # Matches PyTorch ATen cosine_embedding_loss (mean reduction, margin=0).
    s = student_rep.astype(jnp.float32)
    t = teacher_rep.astype(jnp.float32)
    dot = jnp.sum(s * t, axis=-1)
    ss = jnp.sum(s * s, axis=-1) + eps
    tt = jnp.sum(t * t, axis=-1) + eps
    cos = dot / jnp.sqrt(ss * tt)
    per = jnp.where(target > 0, 1.0 - cos, jnp.maximum(cos - margin, 0.0))
    return gamma * jnp.mean(per)


if __name__ == "__main__":
    gamma = 0.5
    key = jax.random.PRNGKey(0)
    k1, k2, k3, k4, k5, k6 = jax.random.split(key, 6)

    # --- Test 1: small demo shape, f32, single tile --------------------------
    N, D = 8, 32
    student = jax.random.normal(k1, (N, D), dtype=jnp.float32)
    teacher = jax.random.normal(k2, (N, D), dtype=jnp.float32)
    target = jnp.where(jax.random.bernoulli(k3, 0.5, (N,)),
                       jnp.float32(1.0), jnp.float32(-1.0))

    loss = cosine_loss(student, teacher, target, gamma=gamma)
    jax.block_until_ready(loss)
    ref = _reference(student, teacher, target, gamma)
    assert jnp.allclose(loss, ref, atol=2e-3, rtol=2e-3), (loss, ref)

    # --- Test 2: bf16 inputs, ragged N, forced row tiling + 2 grid slices ----
    N2, D2 = 40, 128
    student2 = jax.random.normal(k4, (N2, D2), dtype=jnp.float32).astype(jnp.bfloat16)
    teacher2 = jax.random.normal(k5, (N2, D2), dtype=jnp.float32).astype(jnp.bfloat16)
    target2 = jnp.where(jax.random.bernoulli(k6, 0.5, (N2,)),
                        jnp.float32(1.0), jnp.float32(-1.0))

    loss2 = cosine_loss(student2, teacher2, target2, gamma=gamma,
                        block_rows=16, num_slices=2)
    jax.block_until_ready(loss2)
    ref2 = _reference(student2.astype(jnp.float32),
                      teacher2.astype(jnp.float32), target2, gamma)
    assert jnp.allclose(loss2, ref2, atol=1e-2, rtol=1e-2), (loss2, ref2)

    print("KERNEL_OK")
</pallas_src>

<mosaic_0001>
module attributes {stable_mosaic.version = 11 : i64} {
  func.func @_cosine_loss_kernel(%arg0: i32, %arg1: i32, %arg2: memref<8x32xf32, #tpu.memory_space<vmem>>, %arg3: memref<8x32xf32, #tpu.memory_space<vmem>>, %arg4: memref<8x1xf32, #tpu.memory_space<vmem>>, %arg5: memref<1x1xf32, #tpu.memory_space<vmem>>, %arg6: memref<1x1xf32, #tpu.memory_space<vmem>>) attributes {dimension_semantics = [#tpu.dimension_semantics<parallel>, #tpu.dimension_semantics<arbitrary>], iteration_bounds = array<i64: 1, 1>, scalar_prefetch = 0 : i64, scratch_operands = 1 : i64, tpu.core_type = #tpu.core_type<tc>, window_params = [{transform_indices = @transform_0, window_bounds = array<i64: 8, 32>}, {transform_indices = @transform_1, window_bounds = array<i64: 8, 32>}, {transform_indices = @transform_2, window_bounds = array<i64: 8, 1>}, {transform_indices = @transform_3, window_bounds = array<i64: 1, 1>}]} {
    %c0_i32 = arith.constant 0 : i32
    %0 = arith.cmpi eq, %arg1, %c0_i32 : i32
    %1 = arith.extui %0 : i1 to i32
    %c0_i32_0 = arith.constant 0 : i32
    %2 = arith.cmpi ne, %1, %c0_i32_0 : i32
    scf.if %2 {
      %cst_21 = arith.constant 0.000000e+00 : f32
      %39 = vector.broadcast %cst_21 : f32 to vector<1x1xf32>
      %c0_22 = arith.constant 0 : index
      %c0_23 = arith.constant 0 : index
      %40 = vector.load %arg6[%c0_22, %c0_23] : memref<1x1xf32, #tpu.memory_space<vmem>>, vector<1x1xf32>
      tpu.vector_store %arg6[%c0_22, %c0_23], %39 {strides = array<i32>} : memref<1x1xf32, #tpu.memory_space<vmem>>, vector<1x1xf32>,
    } else {
    }
    %c0 = arith.constant 0 : index
    %c0_1 = arith.constant 0 : index
    %3 = vector.load %arg2[%c0, %c0_1] : memref<8x32xf32, #tpu.memory_space<vmem>>, vector<8x32xf32>
    %c0_2 = arith.constant 0 : index
    %c0_3 = arith.constant 0 : index
    %4 = vector.load %arg3[%c0_2, %c0_3] : memref<8x32xf32, #tpu.memory_space<vmem>>, vector<8x32xf32>
    %c0_4 = arith.constant 0 : index
    %c0_5 = arith.constant 0 : index
    %5 = vector.load %arg4[%c0_4, %c0_5] : memref<8x1xf32, #tpu.memory_space<vmem>>, vector<8x1xf32>
    %6 = arith.mulf %3, %4 : vector<8x32xf32>
    %cst = arith.constant dense<0.000000e+00> : vector<8xf32>
    %7 = vector.multi_reduction <add>, %6, %cst [1] : vector<8x32xf32> to vector<8xf32>
    %8 = vector.shape_cast %7 : vector<8xf32> to vector<8x1xf32>
    %9 = arith.mulf %3, %3 : vector<8x32xf32>
    %cst_6 = arith.constant dense<0.000000e+00> : vector<8xf32>
    %10 = vector.multi_reduction <add>, %9, %cst_6 [1] : vector<8x32xf32> to vector<8xf32>
    %11 = vector.shape_cast %10 : vector<8xf32> to vector<8x1xf32>
    %12 = arith.mulf %4, %4 : vector<8x32xf32>
    %cst_7 = arith.constant dense<0.000000e+00> : vector<8xf32>
    %13 = vector.multi_reduction <add>, %12, %cst_7 [1] : vector<8x32xf32> to vector<8xf32>
    %14 = vector.shape_cast %13 : vector<8xf32> to vector<8x1xf32>
    %cst_8 = arith.constant 9.99999996E-13 : f32
    %15 = vector.broadcast %cst_8 : f32 to vector<8x1xf32>
    %16 = arith.addf %11, %15 : vector<8x1xf32>
    %cst_9 = arith.constant 9.99999996E-13 : f32
    %17 = vector.broadcast %cst_9 : f32 to vector<8x1xf32>
    %18 = arith.addf %14, %17 : vector<8x1xf32>
    %19 = arith.mulf %16, %18 : vector<8x1xf32>
    %20 = math.rsqrt %19 : vector<8x1xf32>
    %21 = arith.mulf %8, %20 : vector<8x1xf32>
    %cst_10 = arith.constant 1.000000e+00 : f32
    %22 = vector.broadcast %cst_10 : f32 to vector<8x1xf32>
    %23 = arith.subf %22, %21 : vector<8x1xf32>
    %cst_11 = arith.constant 0.000000e+00 : f32
    %24 = vector.broadcast %cst_11 : f32 to vector<8x1xf32>
    %25 = arith.subf %21, %24 : vector<8x1xf32>
    %cst_12 = arith.constant 0.000000e+00 : f32
    %26 = vector.broadcast %cst_12 : f32 to vector<8x1xf32>
    %27 = arith.maximumf %25, %26 : vector<8x1xf32>
    %cst_13 = arith.constant 0.000000e+00 : f32
    %28 = vector.broadcast %cst_13 : f32 to vector<8x1xf32>
    %29 = arith.cmpf ogt, %5, %28 : vector<8x1xf32>
    %30 = arith.select %29, %23, %27 : vector<8x1xi1>, vector<8x1xf32>
    %c0_14 = arith.constant 0 : index
    %c0_15 = arith.constant 0 : index
    %31 = vector.load %arg6[%c0_14, %c0_15] : memref<1x1xf32, #tpu.memory_space<vmem>>, vector<1x1xf32>
    %cst_16 = arith.constant dense<0.000000e+00> : vector<1xf32>
    %32 = vector.multi_reduction <add>, %30, %cst_16 [0] : vector<8x1xf32> to vector<1xf32>
    %33 = vector.shape_cast %32 : vector<1xf32> to vector<1x1xf32>
    %34 = arith.addf %31, %33 : vector<1x1xf32>
    %c0_17 = arith.constant 0 : index
    %c0_18 = arith.constant 0 : index
    %35 = vector.load %arg6[%c0_17, %c0_18] : memref<1x1xf32, #tpu.memory_space<vmem>>, vector<1x1xf32>
    tpu.vector_store %arg6[%c0_17, %c0_18], %34 {strides = array<i32>} : memref<1x1xf32, #tpu.memory_space<vmem>>, vector<1x1xf32>,
    %c0_i32_19 = arith.constant 0 : i32
    %36 = arith.cmpi eq, %arg1, %c0_i32_19 : i32
    %37 = arith.extui %36 : i1 to i32
    %c0_i32_20 = arith.constant 0 : i32
    %38 = arith.cmpi ne, %37, %c0_i32_20 : i32
    scf.if %38 {
      %c0_21 = arith.constant 0 : index
      %c0_22 = arith.constant 0 : index
      %39 = vector.load %arg6[%c0_21, %c0_22] : memref<1x1xf32, #tpu.memory_space<vmem>>, vector<1x1xf32>
      %c0_23 = arith.constant 0 : index
      %c0_24 = arith.constant 0 : index
      %40 = vector.load %arg5[%c0_23, %c0_24] : memref<1x1xf32, #tpu.memory_space<vmem>>, vector<1x1xf32>
      tpu.vector_store %arg5[%c0_23, %c0_24], %39 {strides = array<i32>} : memref<1x1xf32, #tpu.memory_space<vmem>>, vector<1x1xf32>,
    } else {
    }
    return
  }
  func.func @transform_0(%arg0: i32, %arg1: i32) -> (i32, i32) {
    %c1_i32 = arith.constant 1 : i32
    %0 = arith.muli %arg0, %c1_i32 : i32
    %1 = arith.addi %0, %arg1 : i32
    %c0_i32 = arith.constant 0 : i32
    %2 = arith.minsi %1, %c0_i32 : i32
    %c0_i32_0 = arith.constant 0 : i32
    %c0_i32_1 = arith.constant 0 : i32
    return %2, %c0_i32_0 : i32, i32
  }
  func.func @transform_1(%arg0: i32, %arg1: i32) -> (i32, i32) {
    %c1_i32 = arith.constant 1 : i32
    %0 = arith.muli %arg0, %c1_i32 : i32
    %1 = arith.addi %0, %arg1 : i32
    %c0_i32 = arith.constant 0 : i32
    %2 = arith.minsi %1, %c0_i32 : i32
    %c0_i32_0 = arith.constant 0 : i32
    %c0_i32_1 = arith.constant 0 : i32
    return %2, %c0_i32_0 : i32, i32
  }
  func.func @transform_2(%arg0: i32, %arg1: i32) -> (i32, i32) {
    %c1_i32 = arith.constant 1 : i32
    %0 = arith.muli %arg0, %c1_i32 : i32
    %1 = arith.addi %0, %arg1 : i32
    %c0_i32 = arith.constant 0 : i32
    %2 = arith.minsi %1, %c0_i32 : i32
    %c0_i32_0 = arith.constant 0 : i32
    %c0_i32_1 = arith.constant 0 : i32
    return %2, %c0_i32_0 : i32, i32
  }
  func.func @transform_3(%arg0: i32, %arg1: i32) -> (i32, i32) {
    %c0_i32 = arith.constant 0 : i32
    %c0_i32_0 = arith.constant 0 : i32
    return %arg0, %c0_i32 : i32, i32
  }
}

</mosaic_0001>

<bundles_post_ra>
// kernel: tpu_custom_call.1
= control target key start
LH: loop header
LB: loop body
LE: loop exit
PB: predicated region body
PF: predicated region fallthrough
CT: control target
= control target key end

     0   :  { %8 = vsyncpa [#allocation4], 0  ;;  %s253_s0 = inlined_call_operand.vmem [shape: f32[8,32], index: 0, kind: input, shape index: {}]   ;;  %s254_s1 = inlined_call_operand.hbm [shape: f32[8,32], index: 1, kind: input, shape index: {}]   ;;  %s255_s2 = inlined_call_operand.vmem [shape: f32[8,1], index: 2, kind: input, shape index: {}]   ;;  %s256_s3 = inlined_call_operand.hbm [shape: f32[1,1], index: 3, kind: output, shape index: {}]  }
   0x1   :  { %9 = vsyncpa [#allocation5], 0  ;;  %s215_s12 = smov [#allocation3]  }
   0x2   :  { %s33_s13 = sshll.u32 %s215_s12, 4  ;;  %s34_s13 = int_to_ptr.vmem [resolvable:$true] %s33_s13 }
   0x3   :  { %s179_s14 = scalar_lea.vmem %s34_s13, 128  ;;  %p184_p1 = scmp.lt.s32.totalorder %s34_s13, %s34_s13 }
   0x4   :  { %p180_p0 = scmp.ne.s32.totalorder %s34_s13, %s179_s14  ;;  %p185_p2 = scmp.lt.s32.totalorder %s179_s14, %s179_s14 }
   0x6   :  { %p186_p3 = por %p185_p2, %p184_p1 }
   0x8   :  { %p187_p4 = pnand %p186_p3, %p180_p0 }
   0xa   :  { %190 = shalt.err (!%p187_p4)
}
   0xb   :  { %36 = dma.hbm_to_vmem [thread:$0]  %s254_s1, 128, %s34_s13, [#allocation4]  }
   0xc   :  { %211 = dma.done.wait [#allocation4], 128  }
   0xd   :  { %212 = vsyncadd [#allocation4], 4294967168  ;;  %v95_v0 = vld [vmem:[%s253_s0] sm:$0xff]  ;;  %vm99_vm0 = vcmask 261120   ;;  %vm93_vm1 = vcmask 0   ;;  %v216_v8 = vmov 0.0  }
   0xe   :  { %v96_v1 = vld [vmem:[#allocation3] sm:$0xff]  ;;  %v103_v2 = vmul.f32 %v95_v0, %v95_v0  ;;  %94 = vst.msk [vmem:[#allocation2] sm:$0x1] %vm93_vm1, %v216_v8  ;;  %vm121_vm3 = vcmask 7168   ;;  %s217_s19 = smov [#allocation6]  }
   0xf   :  { %v107_v3 = vmul.f32 %v96_v1, %v96_v1  ;;  %v98_v4 = vmul.f32 %v96_v1, %v95_v0  ;;  %v97_v15 = vld [vmem:[%s255_s2] sm:$0xff]  ;;  %s143_s2 = sshll.u32 %s217_s19, 4  ;;  %s144_s2 = int_to_ptr.vmem [resolvable:$true] %s143_s2 }
  0x10   :  { %v104_v5 = vsel %vm99_vm0, %v103_v2, 0.0  ;;  %vm118_vm2 = vcmp.gt.f32.partialorder %v97_v15, 0.0  ;;  %s191_s20 = scalar_lea.vmem %s144_s2, 16  ;;  %s195_s21 = scalar_lea.vmem %s144_s2, 32 }
  0x11   :  { %v100_v6 = vsel %vm99_vm0, %v98_v4, 0.0  ;;  %105 = vadd.xlane.f32.xlu0 %v104_v5  ;;  %v108_v7 = vsel %vm99_vm0, %v107_v3, 0.0  ;;  %p192_p5 = scmp.ne.s32.totalorder %s144_s2, %s191_s20  ;;  %p196_p6 = scmp.lt.s32.totalorder %s144_s2, %s144_s2 }
  0x12   :  { %101 = vadd.xlane.f32.xlu1 %v100_v6  ;;  %p197_p7 = scmp.lt.s32.totalorder %s195_s21, %s191_s20 }
  0x14   :  { %p198_p8 = por %p197_p7, %p196_p6 }
  0x15   :  { %109 = vadd.xlane.f32.xlu0 %v108_v7  ;;  %v120_v27 = vld [vmem:[#allocation2] sm:$0x1] }
  0x16   :  { %p199_p9 = pnand %p198_p8, %p192_p5 }
  0x9a   :  { %v106_v9 = vpop.xlane.xlu0 %105 }
  0x9b   :  { %v111_v11 = vadd.f32 1e-12, %v106_v9  ;;  %v102_v14 = vpop.xlane.xlu1 %101 }
  0x9e   :  { %v110_v10 = vpop.xlane.xlu0 %109 }
  0x9f   :  { %v112_v12 = vadd.f32 1e-12, %v110_v10 }
  0xa1   :  { %v113_v13 = vmul.f32 %v112_v12, %v111_v11 }
  0xa3   :  { %169 = vrsqrt.f32 %v113_v13 }
  0xb0   :  { %v170_v16 = vpop.eup %169 }
  0xb1   :  { %v115_v17 = vmul.f32 %v170_v16, %v102_v14 }
  0xb3   :  { %v116_v18 = vsub.f32 1.0, %v115_v17  ;;  %v117_v19 = vmax.f32 %v115_v17, 0.0 }
  0xb5   :  { %v119_v20 = vsel %vm118_vm2, %v116_v18, %v117_v19 }
  0xb6   :  { %v122_v21 = vsel %vm121_vm3, %v119_v20, 0.0 }
  0xb7   :  { %v123_v22 = vrot.slane %v122_v21, 4 }
  0xb9   :  { %v124_v23 = vadd.f32 %v123_v22, %v122_v21 }
  0xbb   :  { %v125_v24 = vrot.slane %v124_v23, 2 }
  0xbd   :  { %v126_v25 = vadd.f32 %v125_v24, %v124_v23 }
  0xbf   :  { %v127_v26 = vrot.slane %v126_v25, 1 }
  0xc1   :  { %v128_v28 = vadd.f32 %v127_v26, %v126_v25 }
  0xc3   :  { %v129_v29 = vadd.f32 %v128_v28, %v120_v27 }
  0xc5   :  { %131 = vst.msk [vmem:[#allocation2] sm:$0x1] %vm93_vm1, %v129_v29 }
  0xcc   :  { %v135_v30 = vld [vmem:[#allocation2] sm:$0x1] }
  0xcd   :  { %136 = vst.msk [vmem:[#allocation6] sm:$0x1] %vm93_vm1, %v135_v30 }
  0xce   :  { %202 = shalt.err (!%p199_p9)
}
  0xcf   :  { %146 = dma.vmem_to_hbm [thread:$0]  %s144_s2, 16, %s256_s3, [#allocation5]  }
  0xd0   :  { %213 = dma.done.wait [#allocation5], 16  }
  0xd1   :  { %214 = vsyncadd [#allocation5], 4294967280 }
  0xd2   :  { %150 = vsyncpa [#allocation4], 1 }
  0xd3   :  { %151 = vsyncpa [#allocation5], 1 }

</bundles_post_ra>
